<compile_context>
chip_gen: v7x
topology: tpu7x:2x2x1
jax: 0.10.0
libtpu: 0.0.40
codegen_flags: <defaults>
</compile_context>

<pallas_src>
import functools

import jax
import jax.numpy as jnp
from jax.experimental import pallas as pl
from jax.experimental.pallas import tpu as pltpu

TIMESTEPS = 8          # config.timesteps
_LANE = 128
_MAX_BLOCK_N = 4096    # (8, 4096) f32 tile = 128 KiB; double-buffered fits all chips


def _round_up(x, m):
    return ((x + m - 1) // m) * m


def _flowconf_kernel(wa_ref, x_ref, o_ref):
    # wa_ref: (T, 1)  attention logits, time on sublanes
    # x_ref : (T, n)  one lane tile of the flattened (T, B*C) input
    # o_ref : (1, n)  lane-dense output tile
    w = wa_ref[...].astype(jnp.float32)                       # (T, 1)
    w = w - jnp.max(w, axis=0, keepdims=True)                 # stabilized softmax
    e = jnp.exp(w)
    attn = e * pl.reciprocal(jnp.sum(e, axis=0, keepdims=True), approx=False)

    x = x_ref[...].astype(jnp.float32)                        # (T, n)
    weighted = x * attn                                       # broadcast (T,1) over lanes
    o_ref[...] = jnp.sum(weighted, axis=0, keepdims=True).astype(o_ref.dtype)


@functools.partial(jax.jit, static_argnames=("max_block_n",))
def flowconf_forward(inputline, wa, *, max_block_n=_MAX_BLOCK_N):
    """inputline: (B, C, T), wa: (1, T) -> (B, C)"""
    B, C, T = inputline.shape
    assert wa.shape == (1, T)
    N = B * C

    # Layout plumbing outside the kernel: time -> sublanes, flat B*C -> lanes.
    x_t = jnp.transpose(inputline.reshape(N, T), (1, 0))      # (T, N)
    wa_t = jnp.transpose(wa, (1, 0))                          # (T, 1)

    n_lane = _round_up(N, _LANE)
    if n_lane <= max_block_n:
        block_n, num_blocks = n_lane, 1
    else:
        block_n = max_block_n
        num_blocks = pl.cdiv(n_lane, block_n)
    n_pad = num_blocks * block_n
    if n_pad != N:
        x_t = jnp.pad(x_t, ((0, 0), (0, n_pad - N)))

    out_shape = jax.ShapeDtypeStruct((1, n_pad), inputline.dtype)

    if num_blocks == 1:
        # Single tile: skip grid / pipeline machinery entirely; whole arrays in VMEM.
        out = pl.pallas_call(
            _flowconf_kernel,
            out_shape=out_shape,
            in_specs=[
                pl.BlockSpec(memory_space=pltpu.MemorySpace.VMEM),
                pl.BlockSpec(memory_space=pltpu.MemorySpace.VMEM),
            ],
            out_specs=pl.BlockSpec(memory_space=pltpu.MemorySpace.VMEM),
        )(wa_t, x_t)
    else:
        # Mem-bound tiled path over the flattened N (lane) axis.
        out = pl.pallas_call(
            _flowconf_kernel,
            out_shape=out_shape,
            grid=(num_blocks,),
            in_specs=[
                pl.BlockSpec((T, 1), lambda i: (0, 0)),
                pl.BlockSpec((T, block_n), lambda i: (0, i)),
            ],
            out_specs=pl.BlockSpec((1, block_n), lambda i: (0, i)),
            compiler_params=pltpu.CompilerParams(
                dimension_semantics=("parallel",)),
        )(wa_t, x_t)

    return out[0, :N].reshape(B, C)


def _reference(inputline, wa):
    attn = jax.nn.softmax(wa, axis=-1)
    return (inputline * attn).sum(axis=-1)


if __name__ == "__main__":
    key = jax.random.PRNGKey(0)
    k_x, k_w = jax.random.split(key)

    # Module-sized test: batch=2, channels=4, timesteps=8.
    B, C, T = 2, 4, TIMESTEPS
    wa = jax.random.uniform(k_w, (1, T), dtype=jnp.float32)   # torch.rand-style param
    x = jax.random.normal(k_x, (B, C, T), dtype=jnp.float32)

    out = flowconf_forward(x, wa)
    out = jax.block_until_ready(out)
    ref = _reference(x, wa)
    assert out.shape == (B, C)
    assert jnp.allclose(out, ref, atol=1e-5, rtol=1e-5), "mismatch vs reference (small)"

    # Exercise the tiled / multi-block grid path as well (forced small block).
    B2, C2 = 16, 40                                           # N = 640 -> 5 blocks of 128
    k_x2, _ = jax.random.split(k_x)
    x2 = jax.random.normal(k_x2, (B2, C2, T), dtype=jnp.float32)
    out2 = jax.block_until_ready(flowconf_forward(x2, wa, max_block_n=128))
    ref2 = _reference(x2, wa)
    assert out2.shape == (B2, C2)
    assert jnp.allclose(out2, ref2, atol=1e-5, rtol=1e-5), "mismatch vs reference (tiled)"

    print("KERNEL_OK")
</pallas_src>

<mosaic_0001>
module attributes {stable_mosaic.version = 11 : i64} {
  func.func @_flowconf_kernel(%arg0: memref<8x1xf32, #tpu.memory_space<vmem>>, %arg1: memref<8x128xf32, #tpu.memory_space<vmem>>, %arg2: memref<1x128xf32, #tpu.memory_space<vmem>>) attributes {dimension_semantics = [], scalar_prefetch = 0 : i64, scratch_operands = 0 : i64, tpu.core_type = #tpu.core_type<tc>} {
    %c0 = arith.constant 0 : index
    %c0_0 = arith.constant 0 : index
    %0 = vector.load %arg0[%c0, %c0_0] : memref<8x1xf32, #tpu.memory_space<vmem>>, vector<8x1xf32>
    %cst = arith.constant dense<0xFF800000> : vector<1xf32>
    %1 = vector.multi_reduction <maximumf>, %0, %cst [0] : vector<8x1xf32> to vector<1xf32>
    %2 = vector.shape_cast %1 : vector<1xf32> to vector<1x1xf32>
    %3 = vector.broadcast %2 : vector<1x1xf32> to vector<8x1xf32>
    %4 = arith.subf %0, %3 : vector<8x1xf32>
    %5 = math.exp %4 : vector<8x1xf32>
    %cst_1 = arith.constant dense<0.000000e+00> : vector<1xf32>
    %6 = vector.multi_reduction <add>, %5, %cst_1 [0] : vector<8x1xf32> to vector<1xf32>
    %7 = vector.shape_cast %6 : vector<1xf32> to vector<1x1xf32>
    %8 = tpu.reciprocal %7 : vector<1x1xf32> -> vector<1x1xf32>
    %9 = vector.broadcast %8 : vector<1x1xf32> to vector<8x1xf32>
    %10 = arith.mulf %5, %9 : vector<8x1xf32>
    %c0_2 = arith.constant 0 : index
    %c0_3 = arith.constant 0 : index
    %11 = vector.load %arg1[%c0_2, %c0_3] : memref<8x128xf32, #tpu.memory_space<vmem>>, vector<8x128xf32>
    %12 = vector.broadcast %10 : vector<8x1xf32> to vector<8x128xf32>
    %13 = arith.mulf %11, %12 : vector<8x128xf32>
    %cst_4 = arith.constant dense<0.000000e+00> : vector<128xf32>
    %14 = vector.multi_reduction <add>, %13, %cst_4 [0] : vector<8x128xf32> to vector<128xf32>
    %15 = vector.shape_cast %14 : vector<128xf32> to vector<1x128xf32>
    %c0_5 = arith.constant 0 : index
    %c0_6 = arith.constant 0 : index
    %16 = vector.load %arg2[%c0_5, %c0_6] : memref<1x128xf32, #tpu.memory_space<vmem>>, vector<1x128xf32>
    tpu.vector_store %arg2[%c0_5, %c0_6], %15 {strides = array<i32>} : memref<1x128xf32, #tpu.memory_space<vmem>>, vector<1x128xf32>,
    return
  }
}

</mosaic_0001>

<bundles_post_ra>
// kernel: squeeze.1
= control target key start
LH: loop header
LB: loop body
LE: loop exit
PB: predicated region body
PF: predicated region fallthrough
CT: control target
= control target key end

     0   :  { %s85_s0 = inlined_call_operand.vmem [shape: f32[8], index: 0, kind: input, shape index: {}]   ;;  %s86_s1 = inlined_call_operand.hbm [shape: f32[2,4], index: 1, kind: output, shape index: {}]  }
   0x1   :  { %v5_v0 = vld [vmem:[%s85_s0] sm:$0x1] }
   0x2   :  { %2 = vsyncpa [#allocation1], 0  ;;  %6 = vst [vmem:[#allocation3] sm:$0x1] %v5_v0  ;;  %vm8_vm0 = vcmask 31744   ;;  %s58_s0 = smov 124  }
   0x3   :  { %s59_s8 = smov [#allocation0]  }
   0x4   :  { %s26_s9 = sshll.u32 %s59_s8, 4  ;;  %s27_s9 = int_to_ptr.vmem [resolvable:$true] %s26_s9 }
   0x5   :  { %s34_s10 = scalar_lea.vmem %s27_s9, 32  ;;  %p39_p1 = scmp.lt.s32.totalorder %s27_s9, %s27_s9 }
   0x6   :  { %p35_p0 = scmp.ne.s32.totalorder %s27_s9, %s34_s10  ;;  %p40_p2 = scmp.lt.s32.totalorder %s34_s10, %s34_s10 }
   0x8   :  { %p41_p3 = por %p40_p2, %p39_p1 }
   0x9   :  { %v10_v1 = vld [vmem:[#allocation3] sm:$0x1]  }
   0xa   :  { %v7_v2 = vld [vmem:[#allocation3] sm:$0x1]   ;;  %11 = vrot.lane.b32.xlu0 %v10_v1, %s58_s0  ;;  %p42_p4 = pnand %p41_p3, %p35_p0 }
   0xb   :  { %9 = vst.msk [vmem:[#allocation2] sm:$0x1] %vm8_vm0, %v7_v2  }
  0x7c   :  { %v12_v3 = vpop.permute.xlu0 %11  }
  0x7d   :  { %15 = vst.msk [vmem:[#allocation2 + $0x1] sm:$0x1] %vm8_vm0, %v12_v3  }
  0x84   :  { %v19_v4 = vld [vmem:[#allocation2] sm:$0x3] }
  0x85   :  { %21 = vst [vmem:[#allocation0] sm:$0x3] %v19_v4 }
  0x86   :  { %45 = shalt.err (!%p42_p4)
}
  0x87   :  { %s46_s13 = scalar_lea.hbm %s86_s1, 32 }
  0x88   :  { %p47_p5 = scmp.ne.s32.totalorder %s86_s1, %s46_s13  ;;  %p50_p6 = scmp.lt.u32.totalorder %s46_s13, %s86_s1 }
  0x8a   :  { %p52_p7 = pnand %p50_p6, %p47_p5 }
  0x8c   :  { %55 = shalt.err (!%p52_p7)
}
  0x8d   :  { %29 = dma.vmem_to_hbm [thread:$0]  %s27_s9, 32, %s86_s1, [#allocation1]  }
  0x8e   :  { %56 = dma.done.wait [#allocation1], 32  }
  0x8f   :  { %57 = vsyncadd [#allocation1], 4294967264 }
  0x90   :  { %31 = vsyncpa [#allocation1], 1 }

// kernel: flowconf_forward.1
= control target key start
LH: loop header
LB: loop body
LE: loop exit
PB: predicated region body
PF: predicated region fallthrough
CT: control target
= control target key end

     0   :  { %vm12_vm0 = vcmask 7168   ;;  %v56_v0 = vmov 0   ;;  %s81_s0 = inlined_call_operand.vmem [shape: f32[8,1], index: 0, kind: input, shape index: {}]   ;;  %s82_s1 = inlined_call_operand.vmem [shape: f32[8,128], index: 1, kind: input, shape index: {}]   ;;  %s83_s2 = inlined_call_operand.vmem [shape: f32[1,128], index: 2, kind: output, shape index: {}]  }
   0x1   :  { %51 = vset.pattern.permute.xlu0 %v56_v0  ;;  %v11_v1 = vld [vmem:[%s81_s0] sm:$0xff] }
   0x2   :  { %v13_v2 = vsel %vm12_vm0, %v11_v1, -inf  ;;  %v32_v21 = vld [vmem:[%s82_s1] sm:$0xff] }
   0x3   :  { %v14_v3 = vrot.slane %v13_v2, 4 }
   0x5   :  { %v15_v4 = vmax.f32 %v13_v2, %v14_v3 }
   0x7   :  { %v16_v5 = vrot.slane %v15_v4, 2 }
   0x9   :  { %v17_v6 = vmax.f32 %v15_v4, %v16_v5 }
   0xb   :  { %v18_v7 = vrot.slane %v17_v6, 1 }
   0xd   :  { %v19_v8 = vmax.f32 %v17_v6, %v18_v7 }
   0xf   :  { %v20_v9 = vsub.f32 %v11_v1, %v19_v8 }
  0x11   :  { %v21_v10 = vmul.f32 1.442695, %v20_v9 }
  0x13   :  { %52 = vpow2.f32 %v21_v10 }
  0x1d   :  { %v53_v11 = vpop.eup %52 }
  0x1e   :  { %v23_v12 = vsel %vm12_vm0, %v53_v11, 0.0 }
  0x1f   :  { %v24_v13 = vrot.slane %v23_v12, 4 }
  0x21   :  { %v25_v14 = vadd.f32 %v24_v13, %v23_v12 }
  0x23   :  { %v26_v15 = vrot.slane %v25_v14, 2 }
  0x25   :  { %v27_v16 = vadd.f32 %v26_v15, %v25_v14 }
  0x27   :  { %v28_v17 = vrot.slane %v27_v16, 1 }
  0x29   :  { %v29_v18 = vadd.f32 %v28_v17, %v27_v16 }
  0x2b   :  { %54 = vrcp.f32 %v29_v18 }
  0x35   :  { %v55_v19 = vpop.eup %54 }
  0x36   :  { %v31_v20 = vmul.f32 %v55_v19, %v53_v11 }
  0x38   :  { %35 = vperm.xlu0 %51, %v31_v20  }
  0xb7   :  { %v36_v22 = vpop.permute.xlu0 %35 }
  0xb8   :  { %v38_v23 = vmul.f32 %v36_v22, %v32_v21 }
  0xba   :  { %v39_v24 = vrot.slane %v38_v23, 4 }
  0xbc   :  { %v40_v25 = vadd.f32 %v39_v24, %v38_v23 }
  0xbe   :  { %v41_v26 = vrot.slane %v40_v25, 2 }
  0xc0   :  { %v42_v27 = vadd.f32 %v41_v26, %v40_v25 }
  0xc2   :  { %v43_v28 = vrot.slane %v42_v27, 1 }
  0xc4   :  { %v44_v29 = vadd.f32 %v43_v28, %v42_v27 }
  0xc6   :  { %45 = vst [vmem:[%s83_s2] sm:$0x1] %v44_v29 }

</bundles_post_ra>
